<compile_context>
chip_gen: v5e
topology: v5e:2x2
jax: 0.10.0
libtpu: 0.0.40
codegen_flags: <defaults>
</compile_context>

<pallas_src>
import functools

import jax
import jax.numpy as jnp
from jax.experimental import pallas as pl
from jax.experimental.pallas import tpu as pltpu


def _neg_limit(dtype):
    if jnp.issubdtype(dtype, jnp.floating):
        return -jnp.inf
    return jnp.iinfo(dtype).min


def _global_pool_kernel(x_ref, o_ref, acc_ref, *, pool_type, hw, tk, needs_mask):
    """Reduce one (TM, TK) tile along lanes; accumulate across the (last) K grid axis."""
    k = pl.program_id(1)
    nk = pl.num_programs(1)

    # ---- init accumulator at the start of each row-tile's reduction ----
    @pl.when(k == 0)
    def _():
        if pool_type == "avg":
            acc_ref[...] = jnp.zeros_like(acc_ref)
        else:
            acc_ref[...] = jnp.full_like(acc_ref, _neg_limit(acc_ref.dtype))

    x = x_ref[...]
    if needs_mask:
        # Ragged last K tile: out-of-bounds lanes hold unspecified data -> mask them.
        col = jax.lax.broadcasted_iota(jnp.int32, (1, tk), 1) + k * tk
        valid = col < hw
        if pool_type == "avg":
            x = jnp.where(valid, x, jnp.zeros_like(x))
        else:
            x = jnp.where(valid, x, jnp.full_like(x, _neg_limit(x.dtype)))

    # XLU cross-lane reduce + VPU accumulate: hides under the HBM DMA stream.
    if pool_type == "avg":
        acc_ref[...] += jnp.sum(x.astype(jnp.float32), axis=-1, keepdims=True)
    else:
        acc_ref[...] = jnp.maximum(acc_ref[...], jnp.max(x, axis=-1, keepdims=True))

    # ---- finalize ----
    @pl.when(k == nk - 1)
    def _():
        if pool_type == "avg":
            o_ref[...] = (acc_ref[...] * (1.0 / hw)).astype(o_ref.dtype)
        else:
            o_ref[...] = acc_ref[...].astype(o_ref.dtype)


def _choose_tiles(nc, hw, itemsize, target_bytes=4 << 20):
    """Pick (TM, TK): TM multiple of the sublane packing, TK multiple of 128 (or full dim),
    with one input tile around a few MiB so double-buffering fits every chip's VMEM."""
    sub = max(8, 32 // itemsize)           # 8 rows f32, 16 bf16, 32 int8 per vreg tile
    # Reduction (lane) tile.
    if hw <= 128:
        tk = hw                            # equals full dim -> layout rule satisfied
    else:
        tk = min((hw // 128) * 128, 2048)  # multiple of 128, never larger than the array
    tk_pad = ((tk + 127) // 128) * 128     # lanes pad to 128 in VMEM
    # Row (sublane) tile, bounded by the VMEM budget for one buffer.
    tm_cap = max(sub, (target_bytes // (tk_pad * itemsize)) // sub * sub)
    if nc <= sub:
        tm = nc                            # equals full dim -> layout rule satisfied
    else:
        tm = max(sub, min((nc // sub) * sub, tm_cap, 4096))
    return tm, tk


def global_pooling(x, pool_type):
    """Pallas equivalent of F.max_pool2d / F.avg_pool2d with kernel == (H, W)."""
    assert x.ndim == 4
    assert pool_type in ("avg", "max")
    N, C, H, W = x.shape
    nc, hw = N * C, H * W
    x2 = x.reshape(nc, hw)

    itemsize = jnp.dtype(x.dtype).itemsize
    tm, tk = _choose_tiles(nc, hw, itemsize)
    grid = (pl.cdiv(nc, tm), pl.cdiv(hw, tk))      # rows parallel, reduction axis last
    needs_mask = (hw % tk) != 0
    acc_dtype = jnp.float32 if pool_type == "avg" else x.dtype

    out = pl.pallas_call(
        functools.partial(
            _global_pool_kernel,
            pool_type=pool_type, hw=hw, tk=tk, needs_mask=needs_mask,
        ),
        out_shape=jax.ShapeDtypeStruct((nc, 1), x.dtype),
        grid_spec=pltpu.PrefetchScalarGridSpec(
            num_scalar_prefetch=0,
            grid=grid,
            in_specs=[pl.BlockSpec((tm, tk), lambda i, k: (i, k))],
            out_specs=pl.BlockSpec((tm, 1), lambda i, k: (i, 0)),
            scratch_shapes=[pltpu.VMEM((tm, 1), acc_dtype)],
        ),
        compiler_params=pltpu.CompilerParams(
            dimension_semantics=("parallel", "arbitrary"),
            vmem_limit_bytes=64 << 20,
        ),
    )(x2)

    return out.reshape(N, C, 1, 1)


class GlobalPooling:
    """Stateless module mirroring the PyTorch GlobalPooling (no parameters)."""

    def __init__(self, pool_type):
        assert pool_type == "avg" or pool_type == "max"
        self.pool_type = pool_type

    def __call__(self, x):
        return global_pooling(x, pool_type=self.pool_type)


if __name__ == "__main__":
    key = jax.random.PRNGKey(0)
    x = jax.random.normal(key, (2, 4, 16, 16), dtype=jnp.float32)

    ok = True
    for pool_type in ("avg", "max"):
        mod = GlobalPooling(pool_type)
        y = jax.block_until_ready(mod(x))

        # Pure-JAX reference (matches F.avg_pool2d / F.max_pool2d with full-spatial kernel).
        if pool_type == "avg":
            ref = jnp.mean(x, axis=(2, 3), keepdims=True)
        else:
            ref = jnp.max(x, axis=(2, 3), keepdims=True)

        ok &= (y.shape == (2, 4, 1, 1)) and (y.dtype == x.dtype)
        ok &= bool(jnp.allclose(y, ref, atol=1e-5, rtol=1e-5))

    if ok:
        print("KERNEL_OK")
</pallas_src>

<mosaic_0001>
module attributes {stable_mosaic.version = 11 : i64} {
  func.func @_global_pool_kernel(%arg0: i32, %arg1: i32, %arg2: memref<8x256xf32, #tpu.memory_space<vmem>>, %arg3: memref<8x1xf32, #tpu.memory_space<vmem>>, %arg4: memref<8x1xf32, #tpu.memory_space<vmem>>) attributes {dimension_semantics = [#tpu.dimension_semantics<parallel>, #tpu.dimension_semantics<arbitrary>], iteration_bounds = array<i64: 1, 1>, scalar_prefetch = 0 : i64, scratch_operands = 1 : i64, tpu.core_type = #tpu.core_type<tc>, window_params = [{transform_indices = @transform_0, window_bounds = array<i64: 8, 256>}, {transform_indices = @transform_1, window_bounds = array<i64: 8, 1>}]} {
    %c0_i32 = arith.constant 0 : i32
    %0 = arith.cmpi eq, %arg1, %c0_i32 : i32
    %1 = arith.extui %0 : i1 to i32
    %c0_i32_0 = arith.constant 0 : i32
    %2 = arith.cmpi ne, %1, %c0_i32_0 : i32
    scf.if %2 {
      %cst_8 = arith.constant 0.000000e+00 : f32
      %12 = vector.broadcast %cst_8 : f32 to vector<8x1xf32>
      %c0_9 = arith.constant 0 : index
      %c0_10 = arith.constant 0 : index
      %13 = vector.load %arg4[%c0_9, %c0_10] : memref<8x1xf32, #tpu.memory_space<vmem>>, vector<8x1xf32>
      tpu.vector_store %arg4[%c0_9, %c0_10], %12 {strides = array<i32>} : memref<8x1xf32, #tpu.memory_space<vmem>>, vector<8x1xf32>,
    } else {
    }
    %c0 = arith.constant 0 : index
    %c0_1 = arith.constant 0 : index
    %3 = vector.load %arg2[%c0, %c0_1] : memref<8x256xf32, #tpu.memory_space<vmem>>, vector<8x256xf32>
    %c0_2 = arith.constant 0 : index
    %c0_3 = arith.constant 0 : index
    %4 = vector.load %arg4[%c0_2, %c0_3] : memref<8x1xf32, #tpu.memory_space<vmem>>, vector<8x1xf32>
    %cst = arith.constant dense<0.000000e+00> : vector<8xf32>
    %5 = vector.multi_reduction <add>, %3, %cst [1] : vector<8x256xf32> to vector<8xf32>
    %6 = vector.shape_cast %5 : vector<8xf32> to vector<8x1xf32>
    %7 = arith.addf %4, %6 : vector<8x1xf32>
    %c0_4 = arith.constant 0 : index
    %c0_5 = arith.constant 0 : index
    %8 = vector.load %arg4[%c0_4, %c0_5] : memref<8x1xf32, #tpu.memory_space<vmem>>, vector<8x1xf32>
    tpu.vector_store %arg4[%c0_4, %c0_5], %7 {strides = array<i32>} : memref<8x1xf32, #tpu.memory_space<vmem>>, vector<8x1xf32>,
    %c0_i32_6 = arith.constant 0 : i32
    %9 = arith.cmpi eq, %arg1, %c0_i32_6 : i32
    %10 = arith.extui %9 : i1 to i32
    %c0_i32_7 = arith.constant 0 : i32
    %11 = arith.cmpi ne, %10, %c0_i32_7 : i32
    scf.if %11 {
      %c0_8 = arith.constant 0 : index
      %c0_9 = arith.constant 0 : index
      %12 = vector.load %arg4[%c0_8, %c0_9] : memref<8x1xf32, #tpu.memory_space<vmem>>, vector<8x1xf32>
      %cst_10 = arith.constant 3.906250e-03 : f32
      %13 = vector.broadcast %cst_10 : f32 to vector<8x1xf32>
      %14 = arith.mulf %12, %13 : vector<8x1xf32>
      %c0_11 = arith.constant 0 : index
      %c0_12 = arith.constant 0 : index
      %15 = vector.load %arg3[%c0_11, %c0_12] : memref<8x1xf32, #tpu.memory_space<vmem>>, vector<8x1xf32>
      tpu.vector_store %arg3[%c0_11, %c0_12], %14 {strides = array<i32>} : memref<8x1xf32, #tpu.memory_space<vmem>>, vector<8x1xf32>,
    } else {
    }
    return
  }
  func.func @transform_0(%arg0: i32, %arg1: i32) -> (i32, i32) {
    %c0_i32 = arith.constant 0 : i32
    return %arg0, %arg1 : i32, i32
  }
  func.func @transform_1(%arg0: i32, %arg1: i32) -> (i32, i32) {
    %c0_i32 = arith.constant 0 : i32
    %c0_i32_0 = arith.constant 0 : i32
    return %arg0, %c0_i32 : i32, i32
  }
}

</mosaic_0001>

<bundles_post_ra>
// kernel: tpu_custom_call.1
= control target key start
LH: loop header
LB: loop body
LE: loop exit
PB: predicated region body
PF: predicated region fallthrough
CT: control target
= control target key end

     0   :  { %6 = vsyncpa [#allocation4], 0  ;;  %s76_s9 = smov [#allocation3]   ;;  %s94_s0 = inlined_call_operand.hbm [shape: f32[8,256], index: 0, kind: input, shape index: {}]   ;;  %s95_s1 = inlined_call_operand.vmem [shape: f32[8,1], index: 1, kind: output, shape index: {}]  }
   0x1   :  { %s12_s8 = sshll.u32 %s94_s0, 4  ;;  %s14_s10 = sshll.u32 %s76_s9, 4  ;;  %s13_s8 = int_to_ptr.hbm [resolvable:$true] %s12_s8  ;;  %s15_s10 = int_to_ptr.vmem [resolvable:$true] %s14_s10 }
   0x2   :  { %17 = dma.hbm_to_vmem [thread:$0]  %s13_s8, 256, %s15_s10, [#allocation4]  }
   0x3   :  { %74 = dma.done.wait [#allocation4], 256  }
   0x4   :  { %75 = vsyncadd [#allocation4], 4294967040  ;;  %vm26_vm0 = vcmask 7168   ;;  %v77_v0 = vmov 0.0   ;;  %v28_v1 = vld [vmem:[#allocation3] sm:$0xff]  ;;  %v29_v2 = vld [vmem:[#allocation3 + $0x8] sm:$0xff] }
   0x5   :  { %27 = vst.msk [vmem:[#allocation2] sm:$0xff] %vm26_vm0, %v77_v0  ;;  %v31_v3 = vadd.f32 %v29_v2, %v28_v1 }
   0x7   :  { %32 = vadd.xlane.f32.xlu0 %v31_v3 }
   0xc   :  { %v30_v4 = vld [vmem:[#allocation2] sm:$0xff] }
  0x7a   :  { %v33_v5 = vpop.xlane.xlu0 %32 }
  0x7b   :  { %v34_v6 = vadd.f32 %v33_v5, %v30_v4 }
  0x7d   :  { %36 = vst.msk [vmem:[#allocation2] sm:$0xff] %vm26_vm0, %v34_v6 }
  0x84   :  { %v40_v7 = vld [vmem:[#allocation2] sm:$0xff] }
  0x85   :  { %v41_v8 = vmul.f32 0.00390625, %v40_v7 }
  0x87   :  { %42 = vst.msk [vmem:[%s95_s1] sm:$0xff] %vm26_vm0, %v41_v8 }
  0x88   :  { %47 = vsyncpa [#allocation4], 1 }

</bundles_post_ra>
